<compile_context>
chip_gen: v6e
topology: v6e:2x2x1
jax: 0.10.0
libtpu: 0.0.40
codegen_flags: <defaults>
</compile_context>

<pallas_src>
import functools

import jax
import jax.numpy as jnp
import numpy as np
from jax import lax
from jax.experimental import pallas as pl
from jax.experimental.pallas import tpu as pltpu


def _round_up(x: int, k: int) -> int:
    return ((x + k - 1) // k) * k


# ----------------------------------------------------------------------------
# Pallas kernel: one (batch*head, chunk) step of the chunked GSA recurrence
# ----------------------------------------------------------------------------
def _gsa_chunk_kernel(q_ref, k_ref, v_ref, s_ref, b_ref, o_ref, hk_ref, hvt_ref):
    # q/k/v/o: (T, d)   s/b: (T, m)   hk/hvt: (d, m)
    T, _ = q_ref.shape

    # fresh recurrent state at the start of each (batch, head) sequence
    @pl.when(pl.program_id(1) == 0)
    def _():
        hk_ref[...] = jnp.zeros_like(hk_ref)
        hvt_ref[...] = jnp.zeros_like(hvt_ref)

    q = q_ref[...]
    k = k_ref[...]
    v = v_ref[...]
    s = s_ref[...]
    bcum = b_ref[...]                     # inclusive within-chunk cumsum of log-decay
    b_last = b_ref[pl.ds(T - 1, 1), :]    # (1, m) total chunk log-decay

    # gate factors, computed once on full tiles (EUP work amortized)
    eb = jnp.exp(bcum)                    # exp(B_i)            <= 1
    s_dec = s * jnp.exp(-bcum)            # s_j * exp(-B_j)     (bounded: chunks kept <= 64)
    s_hat = s * jnp.exp(b_last - bcum)    # s_j * exp(B_T - B_j) <= s_j
    ebl = jnp.exp(b_last)                 # exp(B_T)

    # inclusive causal mask within the chunk (j <= i)
    row = lax.broadcasted_iota(jnp.int32, (T, T), 0)
    col = lax.broadcasted_iota(jnp.int32, (T, T), 1)
    causal = (col <= row).astype(jnp.float32)

    hk = hk_ref[...]                      # Hk    (d, m)
    hvt = hvt_ref[...]                    # Hv^T  (d, m)

    # ---- pass 1: slot logits, softmax over slots ---------------------------
    a_qk = lax.dot_general(q, k, (((1,), (1,)), ((), ())),
                           preferred_element_type=jnp.float32) * causal   # (T, T)
    z = eb * (jnp.dot(q, hk, preferred_element_type=jnp.float32)
              + jnp.dot(a_qk, s_dec, preferred_element_type=jnp.float32))  # (T, m)
    z = z - jnp.max(z, axis=-1, keepdims=True)
    p = jnp.exp(z)
    p = p / jnp.sum(p, axis=-1, keepdims=True)  # exact divide: keep validation tolerance

    # ---- pass 2: outputs (one lane-dense (T, d) block store) ---------------
    p_dec = p * eb                                                          # (T, m)
    a_pv = lax.dot_general(p_dec, s_dec, (((1,), (1,)), ((), ())),
                           preferred_element_type=jnp.float32) * causal     # (T, T)
    o = (lax.dot_general(p_dec, hvt, (((1,), (1,)), ((), ())),
                         preferred_element_type=jnp.float32)                # P~ @ Hv
         + jnp.dot(a_pv, v, preferred_element_type=jnp.float32))            # (T, d)
    o_ref[...] = o.astype(o_ref.dtype)

    # ---- state update for the next chunk ------------------------------------
    hk_ref[...] = hk * ebl + lax.dot_general(
        k, s_hat, (((0,), (0,)), ((), ())),
        preferred_element_type=jnp.float32)                                 # K^T @ S^
    hvt_ref[...] = hvt * ebl + lax.dot_general(
        v, s_hat, (((0,), (0,)), ((), ())),
        preferred_element_type=jnp.float32)                                 # V^T @ S^


def gsa_pallas(q, k, v, s, g, chunk_size=64):
    """q,k,v: (b, n, h, head_dim) f32 ; s,g: (b, n, h, num_slots) f32."""
    b, n, h, d = q.shape
    m = s.shape[-1]
    bh = b * h

    # chunk length: multiple of 8 sublanes, capped (keeps exp(-cumsum) bounded
    # and bounds per-chunk VMEM to O(T*(d+m)) even on v7x's 64 MiB)
    T = min(_round_up(chunk_size, 8), _round_up(n, 8))
    n_pad = _round_up(n, T)
    nc = n_pad // T

    def to_bh(x):
        x = jnp.transpose(x, (0, 2, 1, 3)).reshape(bh, n, x.shape[-1])
        if n_pad != n:
            x = jnp.pad(x, ((0, 0), (0, n_pad - n), (0, 0)))
        return x

    qh, kh, vh, sh, gh = map(to_bh, (q, k, v, s, g))
    # within-chunk inclusive cumulative log-decay (plain JAX, replaces g input)
    gcum = jnp.cumsum(gh.reshape(bh, nc, T, m), axis=2).reshape(bh, n_pad, m)

    row_spec = lambda c: pl.BlockSpec((None, T, c), lambda i, j: (i, j, 0))

    out = pl.pallas_call(
        _gsa_chunk_kernel,
        out_shape=jax.ShapeDtypeStruct((bh, n_pad, d), jnp.float32),
        grid_spec=pltpu.PrefetchScalarGridSpec(
            num_scalar_prefetch=0,
            grid=(bh, nc),
            in_specs=[row_spec(d), row_spec(d), row_spec(d),
                      row_spec(m), row_spec(m)],
            out_specs=row_spec(d),
            scratch_shapes=[pltpu.VMEM((d, m), jnp.float32),   # Hk
                            pltpu.VMEM((d, m), jnp.float32)],  # Hv^T
        ),
        compiler_params=pltpu.CompilerParams(
            dimension_semantics=("parallel", "arbitrary")),
    )(qh, kh, vh, sh, gcum)

    out = out[:, :n, :]
    return jnp.transpose(out.reshape(b, h, n, d), (0, 2, 1, 3))


# ----------------------------------------------------------------------------
# Pure-JAX reference of the same recurrence (for a correctness check)
# ----------------------------------------------------------------------------
def gsa_ref(q, k, v, s, g):
    b, n, h, d = q.shape
    m = s.shape[-1]

    def per_head(qh, kh, vh, sh, gh):
        def step(carry, inp):
            hk, hv = carry
            qt, kt, vt, st, gt = inp
            a = jnp.exp(gt)
            hk = hk * a[None, :] + kt[:, None] * st[None, :]
            p = jax.nn.softmax(qt @ hk)
            hv = hv * a[:, None] + st[:, None] * vt[None, :]
            return (hk, hv), p @ hv

        init = (jnp.zeros((d, m), jnp.float32), jnp.zeros((m, d), jnp.float32))
        _, o = lax.scan(step, init, (qh, kh, vh, sh, gh))
        return o

    fn = jax.vmap(jax.vmap(per_head, in_axes=(1, 1, 1, 1, 1), out_axes=1))
    return fn(q, k, v, s, g)


# ----------------------------------------------------------------------------
# Module glue (projections, gating norm) — plain JAX, deterministic init
# ----------------------------------------------------------------------------
def init_params(key, embed_dim, num_heads, num_slots, init_std=0.02):
    head_dim = embed_dim // num_heads
    ks = jax.random.split(key, 8)
    init = lambda k, shape: init_std * jax.random.normal(k, shape, dtype=jnp.float32)
    return {
        "q_proj": init(ks[0], (embed_dim, embed_dim)),
        "k_proj": init(ks[1], (embed_dim, embed_dim)),
        "v_proj": init(ks[2], (embed_dim, embed_dim)),
        "f_proj_0": init(ks[3], (embed_dim, head_dim)),
        "f_proj_1": init(ks[4], (head_dim, num_slots * num_heads)),
        "og_0": init(ks[5], (embed_dim, head_dim)),
        "og_1": init(ks[6], (head_dim, embed_dim)),
        "o_proj": init(ks[7], (embed_dim, embed_dim)),
        "norm_weight": jnp.ones((embed_dim,), dtype=jnp.float32),
    }


def gated_rmsnorm(x, gate, weight, eps=1e-6):
    # gate_act='sigmoid', gate_pos='pre': gate applied before normalization.
    # TODO(synk): exact xmixers 'rmsnorm_fused_gate' internals (num_groups handling)
    # approximated as full-dim gated RMSNorm.
    x = x * jax.nn.sigmoid(gate)
    var = jnp.mean(jnp.square(x), axis=-1, keepdims=True)
    return x * lax.rsqrt(var + eps) * weight


def gsa_forward(params, x, num_heads, num_slots, attn_fn=gsa_pallas):
    b, n, d_model = x.shape
    head_dim = d_model // num_heads

    q = x @ params["q_proj"]
    k = x @ params["k_proj"]
    v = x @ params["v_proj"]
    f = (x @ params["f_proj_0"]) @ params["f_proj_1"]          # (b, n, h*num_slots)
    log_f = jax.nn.log_sigmoid(f)                              # lower_bound is None

    q = jax.nn.silu(q).reshape(b, n, num_heads, head_dim)
    k = jax.nn.silu(k).reshape(b, n, num_heads, head_dim)
    v = v.reshape(b, n, num_heads, head_dim)
    log_f = log_f.reshape(b, n, num_heads, num_slots)
    s = 1.0 - jnp.exp(log_f)

    out = attn_fn(q, k, v, s, log_f)                           # (b, n, h, head_dim)
    out = out.reshape(b, n, d_model)

    gate = (x @ params["og_0"]) @ params["og_1"]               # use_output_gate=True
    out = gated_rmsnorm(out, gate, params["norm_weight"])
    out = out @ params["o_proj"]
    # TODO(synk): past_key_values / attention_mask / lower_bound paths not exercised
    return out


if __name__ == "__main__":
    b, n, embed_dim, num_heads, num_slots = 2, 20, 32, 4, 16
    key = jax.random.PRNGKey(0)
    kx, kp = jax.random.split(key)
    x = jax.random.normal(kx, (b, n, embed_dim), dtype=jnp.float32)
    params = init_params(kp, embed_dim, num_heads, num_slots)

    # chunk_size=8 so the test exercises multi-chunk state carry + tail padding
    attn = functools.partial(gsa_pallas, chunk_size=8)
    out = gsa_forward(params, x, num_heads, num_slots, attn_fn=attn)
    out = jax.block_until_ready(out)

    out_ref = gsa_forward(params, x, num_heads, num_slots, attn_fn=gsa_ref)
    np.testing.assert_allclose(np.asarray(out), np.asarray(out_ref),
                               rtol=5e-4, atol=5e-5)
    print("KERNEL_OK")
</pallas_src>

<mosaic_0001>
module attributes {stable_mosaic.version = 11 : i64} {
  func.func @_gsa_chunk_kernel(%arg0: i32, %arg1: i32, %arg2: memref<1x8x8xf32, #tpu.memory_space<vmem>>, %arg3: memref<1x8x8xf32, #tpu.memory_space<vmem>>, %arg4: memref<1x8x8xf32, #tpu.memory_space<vmem>>, %arg5: memref<1x8x16xf32, #tpu.memory_space<vmem>>, %arg6: memref<1x8x16xf32, #tpu.memory_space<vmem>>, %arg7: memref<1x8x8xf32, #tpu.memory_space<vmem>>, %arg8: memref<8x16xf32, #tpu.memory_space<vmem>>, %arg9: memref<8x16xf32, #tpu.memory_space<vmem>>) attributes {dimension_semantics = [#tpu.dimension_semantics<parallel>, #tpu.dimension_semantics<arbitrary>], iteration_bounds = array<i64: 8, 3>, scalar_prefetch = 0 : i64, scratch_operands = 2 : i64, tpu.core_type = #tpu.core_type<tc>, window_params = [{transform_indices = @transform_0, window_bounds = array<i64: 1, 8, 8>}, {transform_indices = @transform_1, window_bounds = array<i64: 1, 8, 8>}, {transform_indices = @transform_2, window_bounds = array<i64: 1, 8, 8>}, {transform_indices = @transform_3, window_bounds = array<i64: 1, 8, 16>}, {transform_indices = @transform_4, window_bounds = array<i64: 1, 8, 16>}, {transform_indices = @transform_5, window_bounds = array<i64: 1, 8, 8>}]} {
    %c0_i32 = arith.constant 0 : i32
    %0 = arith.cmpi eq, %arg1, %c0_i32 : i32
    %1 = arith.extui %0 : i1 to i32
    %c0_i32_0 = arith.constant 0 : i32
    %2 = arith.cmpi ne, %1, %c0_i32_0 : i32
    scf.if %2 {
      %cst_38 = arith.constant 0.000000e+00 : f32
      %66 = vector.broadcast %cst_38 : f32 to vector<8x16xf32>
      %c0_39 = arith.constant 0 : index
      %c0_40 = arith.constant 0 : index
      %67 = vector.load %arg8[%c0_39, %c0_40] : memref<8x16xf32, #tpu.memory_space<vmem>>, vector<8x16xf32>
      tpu.vector_store %arg8[%c0_39, %c0_40], %66 {strides = array<i32>} : memref<8x16xf32, #tpu.memory_space<vmem>>, vector<8x16xf32>,
      %cst_41 = arith.constant 0.000000e+00 : f32
      %68 = vector.broadcast %cst_41 : f32 to vector<8x16xf32>
      %c0_42 = arith.constant 0 : index
      %c0_43 = arith.constant 0 : index
      %69 = vector.load %arg9[%c0_42, %c0_43] : memref<8x16xf32, #tpu.memory_space<vmem>>, vector<8x16xf32>
      tpu.vector_store %arg9[%c0_42, %c0_43], %68 {strides = array<i32>} : memref<8x16xf32, #tpu.memory_space<vmem>>, vector<8x16xf32>,
    } else {
    }
    %c0 = arith.constant 0 : index
    %c0_1 = arith.constant 0 : index
    %c0_2 = arith.constant 0 : index
    %3 = vector.load %arg2[%c0, %c0_1, %c0_2] : memref<1x8x8xf32, #tpu.memory_space<vmem>>, vector<1x8x8xf32>
    %4 = vector.shape_cast %3 : vector<1x8x8xf32> to vector<8x8xf32>
    %c0_3 = arith.constant 0 : index
    %c0_4 = arith.constant 0 : index
    %c0_5 = arith.constant 0 : index
    %5 = vector.load %arg3[%c0_3, %c0_4, %c0_5] : memref<1x8x8xf32, #tpu.memory_space<vmem>>, vector<1x8x8xf32>
    %6 = vector.shape_cast %5 : vector<1x8x8xf32> to vector<8x8xf32>
    %c0_6 = arith.constant 0 : index
    %c0_7 = arith.constant 0 : index
    %c0_8 = arith.constant 0 : index
    %7 = vector.load %arg4[%c0_6, %c0_7, %c0_8] : memref<1x8x8xf32, #tpu.memory_space<vmem>>, vector<1x8x8xf32>
    %8 = vector.shape_cast %7 : vector<1x8x8xf32> to vector<8x8xf32>
    %c0_9 = arith.constant 0 : index
    %c0_10 = arith.constant 0 : index
    %c0_11 = arith.constant 0 : index
    %9 = vector.load %arg5[%c0_9, %c0_10, %c0_11] : memref<1x8x16xf32, #tpu.memory_space<vmem>>, vector<1x8x16xf32>
    %10 = vector.shape_cast %9 : vector<1x8x16xf32> to vector<8x16xf32>
    %c0_12 = arith.constant 0 : index
    %c0_13 = arith.constant 0 : index
    %c0_14 = arith.constant 0 : index
    %11 = vector.load %arg6[%c0_12, %c0_13, %c0_14] : memref<1x8x16xf32, #tpu.memory_space<vmem>>, vector<1x8x16xf32>
    %12 = vector.shape_cast %11 : vector<1x8x16xf32> to vector<8x16xf32>
    %c0_15 = arith.constant 0 : index
    %c7 = arith.constant 7 : index
    %c0_16 = arith.constant 0 : index
    %13 = vector.load %arg6[%c0_15, %c7, %c0_16] : memref<1x8x16xf32, #tpu.memory_space<vmem>>, vector<1x1x16xf32>
    %14 = vector.shape_cast %13 : vector<1x1x16xf32> to vector<1x16xf32>
    %15 = math.exp %12 : vector<8x16xf32>
    %cst = arith.constant 0.000000e+00 : f32
    %16 = vector.broadcast %cst : f32 to vector<8x16xf32>
    %17 = arith.subf %16, %12 : vector<8x16xf32>
    %18 = math.exp %17 : vector<8x16xf32>
    %19 = arith.mulf %10, %18 : vector<8x16xf32>
    %20 = vector.broadcast %14 : vector<1x16xf32> to vector<8x16xf32>
    %21 = arith.subf %20, %12 : vector<8x16xf32>
    %22 = math.exp %21 : vector<8x16xf32>
    %23 = arith.mulf %10, %22 : vector<8x16xf32>
    %24 = math.exp %14 : vector<1x16xf32>
    %25 = tpu.iota {dimensions = array<i32: 0>} : vector<8x8xi32>
    %26 = tpu.iota {dimensions = array<i32: 1>} : vector<8x8xi32>
    %27 = arith.cmpi sle, %26, %25 : vector<8x8xi32>
    %28 = arith.extui %27 : vector<8x8xi1> to vector<8x8xi32>
    %29 = arith.sitofp %28 : vector<8x8xi32> to vector<8x8xf32>
    %c0_17 = arith.constant 0 : index
    %c0_18 = arith.constant 0 : index
    %30 = vector.load %arg8[%c0_17, %c0_18] : memref<8x16xf32, #tpu.memory_space<vmem>>, vector<8x16xf32>
    %c0_19 = arith.constant 0 : index
    %c0_20 = arith.constant 0 : index
    %31 = vector.load %arg9[%c0_19, %c0_20] : memref<8x16xf32, #tpu.memory_space<vmem>>, vector<8x16xf32>
    %cst_21 = arith.constant dense<0.000000e+00> : vector<8x8xf32>
    %32 = tpu.matmul %4, %6, %cst_21 {dimension_numbers = #tpu.dot_dimension_numbers<[1], [1], [0], [0], [0, 0, 1, 0], [], []>} : vector<8x8xf32>, vector<8x8xf32>, vector<8x8xf32> -> vector<8x8xf32>
    %33 = arith.mulf %32, %29 : vector<8x8xf32>
    %cst_22 = arith.constant dense<0.000000e+00> : vector<8x16xf32>
    %34 = tpu.matmul %4, %30, %cst_22 {dimension_numbers = #tpu.dot_dimension_numbers<[1], [0], [0], [1], [0, 0, 1, 1], [], []>} : vector<8x8xf32>, vector<8x16xf32>, vector<8x16xf32> -> vector<8x16xf32>
    %cst_23 = arith.constant dense<0.000000e+00> : vector<8x16xf32>
    %35 = tpu.matmul %33, %19, %cst_23 {dimension_numbers = #tpu.dot_dimension_numbers<[1], [0], [0], [1], [0, 0, 1, 1], [], []>} : vector<8x8xf32>, vector<8x16xf32>, vector<8x16xf32> -> vector<8x16xf32>
    %36 = arith.addf %34, %35 : vector<8x16xf32>
    %37 = arith.mulf %15, %36 : vector<8x16xf32>
    %cst_24 = arith.constant dense<0xFF800000> : vector<8xf32>
    %38 = vector.multi_reduction <maximumf>, %37, %cst_24 [1] : vector<8x16xf32> to vector<8xf32>
    %39 = vector.shape_cast %38 : vector<8xf32> to vector<8x1xf32>
    %40 = vector.broadcast %39 : vector<8x1xf32> to vector<8x16xf32>
    %41 = arith.subf %37, %40 : vector<8x16xf32>
    %42 = math.exp %41 : vector<8x16xf32>
    %cst_25 = arith.constant dense<0.000000e+00> : vector<8xf32>
    %43 = vector.multi_reduction <add>, %42, %cst_25 [1] : vector<8x16xf32> to vector<8xf32>
    %44 = vector.shape_cast %43 : vector<8xf32> to vector<8x1xf32>
    %45 = vector.broadcast %44 : vector<8x1xf32> to vector<8x16xf32>
    %46 = arith.divf %42, %45 : vector<8x16xf32>
    %47 = arith.mulf %46, %15 : vector<8x16xf32>
    %cst_26 = arith.constant dense<0.000000e+00> : vector<8x8xf32>
    %48 = tpu.matmul %47, %19, %cst_26 {dimension_numbers = #tpu.dot_dimension_numbers<[1], [1], [0], [0], [0, 0, 1, 0], [], []>} : vector<8x16xf32>, vector<8x16xf32>, vector<8x8xf32> -> vector<8x8xf32>
    %49 = arith.mulf %48, %29 : vector<8x8xf32>
    %cst_27 = arith.constant dense<0.000000e+00> : vector<8x8xf32>
    %50 = tpu.matmul %47, %31, %cst_27 {dimension_numbers = #tpu.dot_dimension_numbers<[1], [1], [0], [0], [0, 0, 1, 0], [], []>} : vector<8x16xf32>, vector<8x16xf32>, vector<8x8xf32> -> vector<8x8xf32>
    %cst_28 = arith.constant dense<0.000000e+00> : vector<8x8xf32>
    %51 = tpu.matmul %49, %8, %cst_28 {dimension_numbers = #tpu.dot_dimension_numbers<[1], [0], [0], [1], [0, 0, 1, 1], [], []>} : vector<8x8xf32>, vector<8x8xf32>, vector<8x8xf32> -> vector<8x8xf32>
    %52 = arith.addf %50, %51 : vector<8x8xf32>
    %c0_29 = arith.constant 0 : index
    %c0_30 = arith.constant 0 : index
    %c0_31 = arith.constant 0 : index
    %53 = vector.load %arg7[%c0_29, %c0_30, %c0_31] : memref<1x8x8xf32, #tpu.memory_space<vmem>>, vector<1x8x8xf32>
    %54 = vector.shape_cast %53 : vector<1x8x8xf32> to vector<8x8xf32>
    %55 = vector.shape_cast %52 : vector<8x8xf32> to vector<1x8x8xf32>
    tpu.vector_store %arg7[%c0_29, %c0_30, %c0_31], %55 {strides = array<i32>} : memref<1x8x8xf32, #tpu.memory_space<vmem>>, vector<1x8x8xf32>,
    %56 = vector.broadcast %24 : vector<1x16xf32> to vector<8x16xf32>
    %57 = arith.mulf %30, %56 : vector<8x16xf32>
    %cst_32 = arith.constant dense<0.000000e+00> : vector<8x16xf32>
    %58 = tpu.matmul %6, %23, %cst_32 {dimension_numbers = #tpu.dot_dimension_numbers<[0], [0], [1], [1], [0, 1, 1, 1], [], []>} : vector<8x8xf32>, vector<8x16xf32>, vector<8x16xf32> -> vector<8x16xf32>
    %59 = arith.addf %57, %58 : vector<8x16xf32>
    %c0_33 = arith.constant 0 : index
    %c0_34 = arith.constant 0 : index
    %60 = vector.load %arg8[%c0_33, %c0_34] : memref<8x16xf32, #tpu.memory_space<vmem>>, vector<8x16xf32>
    tpu.vector_store %arg8[%c0_33, %c0_34], %59 {strides = array<i32>} : memref<8x16xf32, #tpu.memory_space<vmem>>, vector<8x16xf32>,
    %61 = vector.broadcast %24 : vector<1x16xf32> to vector<8x16xf32>
    %62 = arith.mulf %31, %61 : vector<8x16xf32>
    %cst_35 = arith.constant dense<0.000000e+00> : vector<8x16xf32>
    %63 = tpu.matmul %8, %23, %cst_35 {dimension_numbers = #tpu.dot_dimension_numbers<[0], [0], [1], [1], [0, 1, 1, 1], [], []>} : vector<8x8xf32>, vector<8x16xf32>, vector<8x16xf32> -> vector<8x16xf32>
    %64 = arith.addf %62, %63 : vector<8x16xf32>
    %c0_36 = arith.constant 0 : index
    %c0_37 = arith.constant 0 : index
    %65 = vector.load %arg9[%c0_36, %c0_37] : memref<8x16xf32, #tpu.memory_space<vmem>>, vector<8x16xf32>
    tpu.vector_store %arg9[%c0_36, %c0_37], %64 {strides = array<i32>} : memref<8x16xf32, #tpu.memory_space<vmem>>, vector<8x16xf32>,
    return
  }
  func.func @transform_0(%arg0: i32, %arg1: i32) -> (i32, i32, i32) {
    %c0_i32 = arith.constant 0 : i32
    %c0_i32_0 = arith.constant 0 : i32
    return %arg0, %arg1, %c0_i32 : i32, i32, i32
  }
  func.func @transform_1(%arg0: i32, %arg1: i32) -> (i32, i32, i32) {
    %c0_i32 = arith.constant 0 : i32
    %c0_i32_0 = arith.constant 0 : i32
    return %arg0, %arg1, %c0_i32 : i32, i32, i32
  }
  func.func @transform_2(%arg0: i32, %arg1: i32) -> (i32, i32, i32) {
    %c0_i32 = arith.constant 0 : i32
    %c0_i32_0 = arith.constant 0 : i32
    return %arg0, %arg1, %c0_i32 : i32, i32, i32
  }
  func.func @transform_3(%arg0: i32, %arg1: i32) -> (i32, i32, i32) {
    %c0_i32 = arith.constant 0 : i32
    %c0_i32_0 = arith.constant 0 : i32
    return %arg0, %arg1, %c0_i32 : i32, i32, i32
  }
  func.func @transform_4(%arg0: i32, %arg1: i32) -> (i32, i32, i32) {
    %c0_i32 = arith.constant 0 : i32
    %c0_i32_0 = arith.constant 0 : i32
    return %arg0, %arg1, %c0_i32 : i32, i32, i32
  }
  func.func @transform_5(%arg0: i32, %arg1: i32) -> (i32, i32, i32) {
    %c0_i32 = arith.constant 0 : i32
    %c0_i32_0 = arith.constant 0 : i32
    return %arg0, %arg1, %c0_i32 : i32, i32, i32
  }
}

</mosaic_0001>

<bundles_post_ra>
// kernel: tpu_custom_call.1
= control target key start
LH: loop header
LB: loop body
LE: loop exit
PB: predicated region body
PF: predicated region fallthrough
CT: control target
= control target key end

     0   :  { %s1466_s18 = smov 0   ;;  %s1468_s19 = smov 0   ;;  %s1614_s0 = inlined_call_operand.vmem [shape: f32[8,24,8], index: 0, kind: input, shape index: {}]   ;;  %s1615_s1 = inlined_call_operand.vmem [shape: f32[8,24,8], index: 1, kind: input, shape index: {}]   ;;  %s1616_s2 = inlined_call_operand.vmem [shape: f32[8,24,8], index: 2, kind: input, shape index: {}]   ;;  %s1617_s3 = inlined_call_operand.vmem [shape: f32[8,24,16], index: 3, kind: input, shape index: {}]   ;;  %s1618_s4 = inlined_call_operand.vmem [shape: f32[8,24,16], index: 4, kind: input, shape index: {}]   ;;  %s1619_s5 = inlined_call_operand.vmem [shape: f32[8,24,8], index: 5, kind: output, shape index: {}]  }
   0x1   :  { %s1470_s20 = smov 0   ;;  %s1472_s21 = smov 0  }
   0x2   :  { %s1474_s22 = smov 0  }
   0x3 LB: > { %s24_s23 = sadd.s32 1, %s1423_s20  ;;  %s27_s24 = sadd.s32 1, %s1427_s21  ;;  %s1431_s22 = sphi %s1474_s22, %s15_s22   ;;  %s1427_s21 = sphi %s1472_s21, %s1623_s21   ;;  %s1423_s20 = sphi %s1470_s20, %s1622_s20   ;;  %s1419_s19 = sphi %s1468_s19, %s1621_s19   ;;  %s1415_s18 = sphi %s1466_s18, %s1620_s18  }
   0x4   : > { %p25_p0 = scmp.ge.s32.totalorder %s24_s23, 3  ;;  %p1259_p1 = scmp.ge.s32.totalorder %s1431_s22, 1 }
   0x5   : > { %p266_p2 = scmp.lt.s32.totalorder %s1431_s22, 25 }
   0x6   : > { %s1625_s23 = smov (%p25_p0, %s24_s23), 0  ;;  %s1627_s24 = smov (!%p25_p0, %s27_s24), %s1427_s21 }
   0x7   : > { %p267_p3 = pnand %p1259_p1, %p266_p2  ;;  %p29_p4 = scmp.ge.s32.totalorder %s1627_s24, 8 }
   0x8   : > { %p332_p5 = scmp.lt.s32.totalorder (!%p267_p3), %s1419_s19, 7  ;;  %p334_p6 = scmp.lt.s32.totalorder (!%p267_p3), %s1415_s18, 2 }
   0x9   : > { %s1629_s24 = smov (%p29_p4, %s1627_s24), 0  ;;  %270 = sbr.rel (%p267_p3) target bundleno = 1135 (0x46f), region = 40 }
   0xa   : > { %p1266_p7 = scmp.ne.s32.totalorder (!%p267_p3), %s1415_s18, 0 }
   0xe   : > { %s1631_s19 = smov (!%p332_p5, %s1419_s19), 7 }
   0xf   : > { %s335_s25 = scalar_select %p334_p6, %s1415_s18, 2 }
  0x10   : > { %s1337_s26 = smul.u32 3, %s1631_s19 }
  0x12   : > { %s337_s27 = sadd.s32 %s1337_s26, %s335_s25  ;;  %383 = sbr.rel (%p1266_p7) target bundleno = 25 (0x19), region = 44 }
  0x13   : > { %s1500_s28 = sshll.u32 %s337_s27, 3 }
  0x14   : > { %s339_s6 = scalar_lea.vmem %s1614_s0, %s1500_s28  ;;  %s347_s9 = scalar_lea.vmem %s1615_s1, %s1500_s28 }
  0x15   : > { %s355_s12 = scalar_lea.vmem %s1616_s2, %s1500_s28  ;;  %s363_s15 = scalar_lea.vmem %s1617_s3, %s1500_s28 }
  0x16   : > { %s371_s19 = scalar_lea.vmem %s1618_s4, %s1500_s28  ;;  %s379_s27 = scalar_lea.vmem %s1619_s5, %s1500_s28 }
  0x17   : > { %vm384_vm0 = vcmask 130048   ;;  %v1433_v0 = vmov 0.0  }
  0x18   : > { %385 = vst.msk [vmem:[#allocation2] sm:$0xff] %vm384_vm0, %v1433_v0  ;;  %386 = vst.msk [vmem:[#allocation3] sm:$0xff] %vm384_vm0, %v1433_v0 }
  0x19 PF: > { %v388_v1 = vld [vmem:[%s347_s9] sm:$0xff]  ;;  %vm418_vm1 = vcmask 64512   ;;  %v1434_v2 = vmov 0.0   ;;  %vm1435_vm2 = vmmov 0   ;;  %v399_v4 = vlaneseq }
  0x1a   : > { %1297 = vmatprep.subr.mxu0 %v1434_v2  ;;  %1299 = vmatprep.mubr.msk.f32.mxu0 %vm1435_vm2, %v1434_v2  ;;  %v387_v3 = vld [vmem:[%s339_s6] sm:$0xff]  ;;  %vm640_vm4 = vcmask 130048  }
  0x1b   : > { %1298 = vmatpush3.xpose.msk.msra.mxu0 %vm418_vm1, %v388_v1  ;;  %1302 = vmatprep.subr.mxu1 %v1434_v2  ;;  %v1538_v5 = vshrl.u32 %v399_v4, 7  ;;  %v1541_v7 = vld [vmem:[%s371_s19 + $0x7] sm:$0x1]  ;;  %v412_v19 = vand.u32 127, %v399_v4 }
  0x1c   : > { %1304 = vmatprep.mubr.msk.f32.mxu1 %vm1435_vm2, %v1434_v2  ;;  %1312 = vmatprep.subr.mxu0 %v1434_v2  ;;  %v391_v9 = vld [vmem:[%s371_s19] sm:$0xff]  ;;  %v407_v52 = vmul.f32 1.442695, %v1541_v7 }
  0x1d   : > { %882 = vxpose.xlu1.b32.start.end [1/1] (short) (narrow) %v388_v1, 8  ;;  %v401_v6 = vsub.s32 0, %v1538_v5  ;;  %v395_v11 = vsub.f32 0.0, %v391_v9  ;;  %v390_v16 = vld [vmem:[%s363_s15] sm:$0xff]  ;;  %vm413_vm3 = vcmp.le.s32.totalorder %v412_v19, %v1538_v5  ;;  %v393_v25 = vmul.f32 1.442695, %v391_v9 }
  0x1e   : > { %1300 = vmatmul.mubr.msk.f32.vlgmr.msra.gmra.mxu0 %vm418_vm1, %v387_v3  ;;  %v1267_v20 = vsel %vm413_vm3, 1.0, %v1434_v2  ;;  %v389_v39 = vld [vmem:[%s355_s12] sm:$0xff] }
  0x1f   : > { %1314 = vmatprep.mubr.msk.f32.mxu0 %vm1435_vm2, %v1434_v2  ;;  %v402_v8 = vrot.slane %v1541_v7, %v401_v6  ;;  %v396_v13 = vmul.f32 1.442695, %v395_v11  ;;  %v1554_v23 = vld [vmem:[#allocation2] sm:$0xff]  ;;  %v417_v44 = vld [vmem:[#allocation3] sm:$0xff] }
  0x21   : > { %v403_v10 = vsub.f32 %v402_v8, %v391_v9  ;;  %990 = vxpose.xlu1.b32.start.end [1/1] (short) (narrow) %v389_v39, 8 }
  0x23   : > { %v404_v12 = vmul.f32 1.442695, %v403_v10 }
  0x25   : > { %1381 = vpow2.f32 %v404_v12 }
  0x26   : > { %1383 = vpow2.f32 %v396_v13 }
  0x27   : > { %1385 = vpow2.f32 %v393_v25 }
  0x32   : > { %v1382_v14 = vpop.eup %1381 }
  0x33   : > { %v1384_v15 = vpop.eup %1383  ;;  %v406_v18 = vmul.f32 %v1382_v14, %v390_v16 }
  0x34   : > { %v398_v17 = vmul.f32 %v1384_v15, %v390_v16  ;;  %v1386_v28 = vpop.eup %1385 }
  0x36   : > { %1303 = vmatpush3.msra.mxu1 %v398_v17  ;;  %1313 = vmatpush3.xpose.msk.msra.mxu0 %vm640_vm4, %v398_v17 }
  0x37   : > { %1307 = vmatprep.subr.mxu1 %v1434_v2  ;;  %1322 = vmatprep.subr.mxu0 %v1434_v2 }
  0x99   : > { %v898_v45 = vpop.trf.xlu1 }
  0x9d   : > { %v1006_v46 = vpop.trf.xlu1 }
  0xde   : > { %v491_v21 = vpop.f32.mrf.mxu0 }
  0xdf   : > { %v495_v22 = vmul.f32 %v1267_v20, %v491_v21 }
  0xe0   : > { %v1301_v24 = vpop.f32.mrf.mxu0 }
  0xe1   : > { %1305 = vmatmul.mubr.msk.f32.vlgmr.msra.gmra.mxu1 %vm418_vm1, %v495_v22 }
  0xe2   : > { %1308 = vmatpush3.msra.mxu1 %v1554_v23  ;;  %1309 = vmatprep.mubr.msk.f32.mxu1 %vm1435_vm2, %v1434_v2 }
  0xe3   : > { %1317 = vmatprep.subr.mxu1 %v1434_v2 }
  0xe5   : > { %1310 = vmatmul.mubr.msk.f32.vlgmr.msra.gmra.mxu1 %vm418_vm1, %v387_v3 }
  0xe6   : > { %1319 = vmatprep.mubr.msk.f32.mxu1 %vm1435_vm2, %v1434_v2  ;;  %1318 = vmatpush3.msra.mxu1 %v389_v39 }
  0xe7   : > { %1327 = vmatprep.subr.mxu1 %v1434_v2 }
 0x1a1   : > { %v565_v26 = vpop.f32.mrf.mxu1 }
 0x1a3   : > { %v1306_v27 = vpop.f32.mrf.mxu1 }
 0x1a5   : > { %v635_v29 = vpop.f32.mrf.mxu1 }
 0x1a6   : > { %v636_v30 = vadd.f32 %v635_v29, %v565_v26 }
 0x1a7   : > { %v1311_v31 = vpop.f32.mrf.mxu1 }
 0x1a8   : > { %v639_v32 = vmul.f32 %v1386_v28, %v636_v30 }
 0x1aa   : > { %v641_v33 = vsel %vm640_vm4, %v639_v32, -inf }
 0x1ab   : > { %642 = vmax.xlane.f32.xlu0 %v641_v33 }
 0x234   : > { %v643_v34 = vpop.xlane.xlu0 %642 }
 0x235   : > { %v644_v35 = vsub.f32 %v639_v32, %v643_v34 }
 0x237   : > { %v645_v36 = vmul.f32 1.442695, %v644_v35 }
 0x239   : > { %1387 = vpow2.f32 %v645_v36 }
 0x246   : > { %v1388_v37 = vpop.eup %1387 }
 0x247   : > { %v647_v38 = vsel %vm640_vm4, %v1388_v37, 0.0 }
 0x248   : > { %648 = vadd.xlane.f32.xlu0 %v647_v38 }
 0x2d1   : > { %v649_v40 = vpop.xlane.xlu0 %648 }
 0x2d2   : > { %1389 = vrcp.f32 %v649_v40 }
 0x2d3   : > { %1391 = vpow2.f32 %v407_v52 }
 0x2df   : > { %v1390_v41 = vpop.eup %1389 }
 0x2e0   : > { %v651_v42 = vmul.f32 %v1390_v41, %v1388_v37  ;;  %v1392_v53 = vpop.eup %1391 }
 0x2e1   : > { %v880_v54 = vrot.slane %v1392_v53, %v401_v6 }
 0x2e2   : > { %v652_v43 = vmul.f32 %v1386_v28, %v651_v42 }
 0x2e3   : > { %v989_v56 = vmul.f32 %v880_v54, %v417_v44  ;;  %v881_v61 = vmul.f32 %v880_v54, %v1554_v23 }
 0x2e4   : > { %1315 = vmatmul.mubr.msk.f32.vlgmr.msra.gmra.mxu0 %vm640_vm4, %v652_v43 }
 0x2e5   : > { %1323 = vmatpush3.xpose.msk.msra.mxu0 %vm640_vm4, %v417_v44  ;;  %1324 = vmatprep.mubr.msk.f32.mxu0 %vm1435_vm2, %v1434_v2 }
 0x2e6   : > { %1332 = vmatprep.subr.mxu0 %v1434_v2 }
 0x2e8   : > { %1325 = vmatmul.mubr.msk.f32.vlgmr.msra.gmra.mxu0 %vm640_vm4, %v652_v43 }
 0x2e9   : > { %1333 = vmatpush3.msra.mxu0 %v406_v18  ;;  %1334 = vmatprep.mubr.msk.f32.mxu0 %vm1435_vm2, %v1434_v2 }
 0x2ec   : > { %1335 = vmatmul.mubr.msk.f32.vlgmr.msra.gmra.mxu0 %vm418_vm1, %v1006_v46 }
 0x3a4   : > { %v725_v47 = vpop.f32.mrf.mxu0 }
 0x3a5   : > { %v729_v48 = vmul.f32 %v1267_v20, %v725_v47 }
 0x3a6   : > { %v1316_v49 = vpop.f32.mrf.mxu0 }
 0x3a7   : > { %1320 = vmatmul.mubr.msk.f32.vlgmr.msra.gmra.mxu1 %vm418_vm1, %v729_v48 }
 0x3a8   : > { %1328 = vmatpush3.msra.mxu1 %v406_v18  ;;  %v872_v50 = vpop.f32.mrf.mxu0  ;;  %1329 = vmatprep.mubr.msk.f32.mxu1 %vm1435_vm2, %v1434_v2 }
 0x3aa   : > { %v1326_v51 = vpop.f32.mrf.mxu0 }
 0x3ab   : > { %1330 = vmatmul.mubr.msk.f32.vlgmr.msra.gmra.mxu1 %vm418_vm1, %v898_v45 }
 0x3ac   : > { %v1091_v55 = vpop.f32.mrf.mxu0 }
 0x3ad   : > { %v1095_v58 = vadd.f32 %v1091_v55, %v989_v56 }
 0x3ae   : > { %v1336_v57 = vpop.f32.mrf.mxu0 }
 0x3af   : > { %1096 = vst.msk [vmem:[#allocation3] sm:$0xff] %vm640_vm4, %v1095_v58 }
 0x467   : > { %v799_v59 = vpop.f32.mrf.mxu1 }
 0x468   : > { %v873_v60 = vadd.f32 %v872_v50, %v799_v59 }
 0x469   : > { %v1321_v62 = vpop.f32.mrf.mxu1 }
 0x46a   : > { %876 = vst.msk [vmem:[%s379_s27] sm:$0xff] %vm418_vm1, %v873_v60 }
 0x46b   : > { %v983_v63 = vpop.f32.mrf.mxu1 }
 0x46c   : > { %v987_v0 = vadd.f32 %v983_v63, %v881_v61 }
 0x46d   : > { %v1331_v1 = vpop.f32.mrf.mxu1 }
 0x46e   : > { %988 = vst.msk [vmem:[#allocation2] sm:$0xff] %vm640_vm4, %v987_v0 }
 0x46f PF: > { %s15_s22 = sadd.s32 1, %s1431_s22   ;;  %s1620_s18 = smov %s1423_s20 }
 0x470   : > { %p12_p8 = scmp.ge.s32.totalorder %s15_s22, 26   ;;  %s1621_s19 = smov %s1427_s21 }
 0x471   : > { %s1622_s20 = smov %s1625_s23  ;;  %s1623_s21 = smov %s1629_s24 }
 0x472   :  { %14 = sbr.rel (!%p12_p8) target bundleno = 3 (0x3), region = 86 }

</bundles_post_ra>
